<compile_context>
chip_gen: v5e
topology: v5e:2x2
jax: 0.10.0
libtpu: 0.0.40
codegen_flags: <defaults>
</compile_context>

<pallas_src>
import functools

import jax
import jax.numpy as jnp
from jax import lax
from jax.experimental import pallas as pl
from jax.experimental.pallas import tpu as pltpu


def _shift_flat(plane, t, nb):
    """out[:, p] = plane[:, p + t] if 0 <= p + t < HW else 0  (static t)."""
    if t == 0:
        return plane
    if t > 0:
        zeros = jnp.zeros((nb, t), dtype=plane.dtype)
        return jnp.concatenate([plane[:, t:], zeros], axis=1)
    zeros = jnp.zeros((nb, -t), dtype=plane.dtype)
    return jnp.concatenate([zeros, plane[:, :t]], axis=1)


def _spatial_attention_kernel(w_ref, b_ref, x_ref, o_ref,
                              *, C, H, W, K, pad, out_ch):
    """One grid step: nb images -> channel mean/max -> KxK same-conv -> sigmoid.

    w_ref : (out_ch*2*K*K,)  f32, SMEM (scalar prefetch)
    b_ref : (out_ch,)        f32, SMEM (scalar prefetch)
    x_ref : (nb, C, H*W)     native dtype, VMEM (lane-dense flattened HW)
    o_ref : (nb, H*W) if out_ch == 1 else (nb, out_ch, H*W), input dtype, VMEM
    """
    HW = H * W
    nb = x_ref.shape[0]

    # Channel pooling without materializing an f32 copy of the whole block:
    # loop over channels, cast each (nb, HW) slice, accumulate sum / max.
    # (For large C a (C, N, HW) wrapper layout would make this a dense
    # leading-axis VPU reduce; C is tiny for RSSAN so the slice loop is fine.)
    x0 = x_ref[:, 0, :].astype(jnp.float32)
    s = x0
    m = x0
    for c in range(1, C):
        xc = x_ref[:, c, :].astype(jnp.float32)
        s = s + xc
        m = jnp.maximum(m, xc)
    avg = s * jnp.float32(1.0 / C)

    # Hoisted column masks.  The zero-fill flat shift already zeroes the
    # top/bottom row boundary; only horizontal wrap across rows needs masking.
    col = lax.broadcasted_iota(jnp.int32, (1, HW), 1) % W
    col_masks = []
    for kx in range(K):
        dx = kx - pad
        if dx > 0:
            col_masks.append(col < W - dx)
        elif dx < 0:
            col_masks.append(col >= -dx)
        else:
            col_masks.append(None)

    # Per-output-channel accumulators, bias pre-broadcast once.
    accs = [jnp.full((nb, HW), b_ref[oc], dtype=jnp.float32)
            for oc in range(out_ch)]

    # K x K taps; shifted/masked planes are shared by all output channels.
    # (For large out_ch this should become an MXU matmul over the stacked
    # 2*K*K planes; with out_ch == 1 the VPU path is the right one.)
    for ky in range(K):
        dy = ky - pad
        for kx in range(K):
            dx = kx - pad
            t = dy * W + dx
            sa = _shift_flat(avg, t, nb)
            sm = _shift_flat(m, t, nb)
            mask = col_masks[kx]
            if mask is not None:
                sa = jnp.where(mask, sa, 0.0)
                sm = jnp.where(mask, sm, 0.0)
            for oc in range(out_ch):
                w_a = w_ref[(oc * 2 + 0) * K * K + ky * K + kx]
                w_m = w_ref[(oc * 2 + 1) * K * K + ky * K + kx]
                accs[oc] = accs[oc] + w_a * sa + w_m * sm

    if out_ch == 1:
        o_ref[...] = jax.nn.sigmoid(accs[0]).astype(o_ref.dtype)
    else:
        for oc in range(out_ch):
            o_ref[:, oc, :] = jax.nn.sigmoid(accs[oc]).astype(o_ref.dtype)


def _pick_batch_block(n, bytes_per_img, target_bytes):
    """Largest batch block <= budget; prefer sublane-aligned divisors of n."""
    cap = max(1, min(n, target_bytes // max(1, bytes_per_img)))
    if cap >= n:
        return n
    for nb in range(cap, 0, -1):          # divisor of n, multiple of 8
        if n % nb == 0 and nb % 8 == 0:
            return nb
    for nb in range(cap, 0, -1):          # any divisor of n
        if n % nb == 0:
            return nb
    return 1


def spatial_attention(x, weight, bias, *, stride=1, padding=1):
    """x: (N, C, H, W); weight: (out_ch, 2, K, K); bias: (out_ch,)."""
    N, C, H, W = x.shape
    out_ch, two, K, K2 = weight.shape
    assert two == 2 and K == K2, "conv expects 2 input channels (avg, max)"
    # TODO(synk): only the stride=1 "same"-padding configuration used by RSSAN
    # is implemented; general stride / padding would need an output-subsampling
    # path instead of the flat-shift conv.
    assert stride == 1 and 2 * padding == K - 1, \
        "shift-conv path needs same-padding, stride 1"
    HW = H * W

    x_flat = x.reshape(N, C, HW)                      # lane-dense spatial axis
    w_flat = weight.reshape(-1).astype(jnp.float32)   # SMEM-friendly 1-D
    b = bias.astype(jnp.float32)
    out_dtype = x.dtype

    # Batch block: target ~8 MiB input blocks (amortizes per-step overhead,
    # keeps HBM DMAs near roofline); no forced >=2-step split.
    bytes_per_img = C * HW * x.dtype.itemsize
    nb = _pick_batch_block(N, bytes_per_img, 8 * 1024 * 1024)

    # VMEM budget: double-buffered input + output blocks plus in-kernel f32
    # temporaries (pooled planes, shifted taps, accumulators).
    out_bytes_per_img = out_ch * HW * jnp.dtype(out_dtype).itemsize
    f32_temps = 8 * nb * HW * 4
    needed = 2 * nb * bytes_per_img + 2 * nb * out_bytes_per_img + f32_temps
    vmem_limit = int(min(64 * 1024 * 1024, max(32 * 1024 * 1024, 2 * needed)))

    kernel = functools.partial(
        _spatial_attention_kernel,
        C=C, H=H, W=W, K=K, pad=padding, out_ch=out_ch)

    if out_ch == 1:
        out_shape = jax.ShapeDtypeStruct((N, HW), out_dtype)
        out_spec = pl.BlockSpec((nb, HW), lambda n, w, bb: (n, 0))
    else:
        out_shape = jax.ShapeDtypeStruct((N, out_ch, HW), out_dtype)
        out_spec = pl.BlockSpec((nb, out_ch, HW), lambda n, w, bb: (n, 0, 0))

    out = pl.pallas_call(
        kernel,
        out_shape=out_shape,
        grid_spec=pltpu.PrefetchScalarGridSpec(
            num_scalar_prefetch=2,            # weights + bias -> SMEM, once
            grid=(N // nb,),
            in_specs=[
                # nb images per grid step, streamed in native dtype.
                pl.BlockSpec((nb, C, HW), lambda n, w, bb: (n, 0, 0)),
            ],
            out_specs=out_spec,
        ),
        compiler_params=pltpu.CompilerParams(
            dimension_semantics=("parallel",),
            vmem_limit_bytes=vmem_limit),
    )(w_flat, b, x_flat)

    return out.reshape(N, out_ch, H, W)


def _reference(x, weight, bias, *, stride=1, padding=1):
    avg = jnp.mean(x, axis=1, keepdims=True)
    mx = jnp.max(x, axis=1, keepdims=True)
    y = jnp.concatenate([avg, mx], axis=1)
    conv = jax.lax.conv_general_dilated(
        y, weight,
        window_strides=(stride, stride),
        padding=[(padding, padding), (padding, padding)],
        dimension_numbers=("NCHW", "OIHW", "NCHW"))
    return jax.nn.sigmoid(conv + bias[None, :, None, None])


if __name__ == "__main__":
    # Module config: Spatial_attention(in_chanels=2, kernel_size=3,
    #                                  out_chanel=1, stride=1, padding=1)
    N, C, H, W = 2, 4, 16, 16
    out_ch, K, stride, padding = 1, 3, 1, 1

    key = jax.random.PRNGKey(0)
    kx, kw, kb = jax.random.split(key, 3)
    x = jax.random.normal(kx, (N, C, H, W), dtype=jnp.float32)
    weight = 0.1 * jax.random.normal(kw, (out_ch, 2, K, K), dtype=jnp.float32)
    bias = 0.1 * jax.random.normal(kb, (out_ch,), dtype=jnp.float32)

    out = spatial_attention(x, weight, bias, stride=stride, padding=padding)
    out = jax.block_until_ready(out)

    ref = _reference(x, weight, bias, stride=stride, padding=padding)
    assert out.shape == (N, out_ch, H, W), out.shape
    assert jnp.allclose(out, ref, atol=1e-5, rtol=1e-5), (
        float(jnp.max(jnp.abs(out - ref))))

    print("KERNEL_OK")
</pallas_src>

<mosaic_0001>
module attributes {stable_mosaic.version = 11 : i64} {
  func.func @_spatial_attention_kernel(%arg0: i32, %arg1: memref<18xf32, #tpu.memory_space<smem>>, %arg2: memref<1xf32, #tpu.memory_space<smem>>, %arg3: memref<2x4x256xf32, #tpu.memory_space<vmem>>, %arg4: memref<2x256xf32, #tpu.memory_space<vmem>>) attributes {dimension_semantics = [#tpu.dimension_semantics<parallel>], iteration_bounds = array<i64: 1>, scalar_prefetch = 2 : i64, scratch_operands = 0 : i64, tpu.core_type = #tpu.core_type<tc>, window_params = [{transform_indices = @transform_0, window_bounds = array<i64: 2, 4, 256>}, {transform_indices = @transform_1, window_bounds = array<i64: 2, 256>}]} {
    %c0 = arith.constant 0 : index
    %c0_0 = arith.constant 0 : index
    %c0_1 = arith.constant 0 : index
    %0 = vector.load %arg3[%c0, %c0_0, %c0_1] : memref<2x4x256xf32, #tpu.memory_space<vmem>>, vector<2x1x256xf32>
    %1 = vector.shape_cast %0 : vector<2x1x256xf32> to vector<2x256xf32>
    %c0_2 = arith.constant 0 : index
    %c1 = arith.constant 1 : index
    %c0_3 = arith.constant 0 : index
    %2 = vector.load %arg3[%c0_2, %c1, %c0_3] : memref<2x4x256xf32, #tpu.memory_space<vmem>>, vector<2x1x256xf32>
    %3 = vector.shape_cast %2 : vector<2x1x256xf32> to vector<2x256xf32>
    %4 = arith.addf %1, %3 : vector<2x256xf32>
    %5 = arith.maximumf %1, %3 : vector<2x256xf32>
    %c0_4 = arith.constant 0 : index
    %c2 = arith.constant 2 : index
    %c0_5 = arith.constant 0 : index
    %6 = vector.load %arg3[%c0_4, %c2, %c0_5] : memref<2x4x256xf32, #tpu.memory_space<vmem>>, vector<2x1x256xf32>
    %7 = vector.shape_cast %6 : vector<2x1x256xf32> to vector<2x256xf32>
    %8 = arith.addf %4, %7 : vector<2x256xf32>
    %9 = arith.maximumf %5, %7 : vector<2x256xf32>
    %c0_6 = arith.constant 0 : index
    %c3 = arith.constant 3 : index
    %c0_7 = arith.constant 0 : index
    %10 = vector.load %arg3[%c0_6, %c3, %c0_7] : memref<2x4x256xf32, #tpu.memory_space<vmem>>, vector<2x1x256xf32>
    %11 = vector.shape_cast %10 : vector<2x1x256xf32> to vector<2x256xf32>
    %12 = arith.addf %8, %11 : vector<2x256xf32>
    %13 = arith.maximumf %9, %11 : vector<2x256xf32>
    %cst = arith.constant 2.500000e-01 : f32
    %14 = vector.broadcast %cst : f32 to vector<2x256xf32>
    %15 = arith.mulf %12, %14 : vector<2x256xf32>
    %16 = tpu.iota {dimensions = array<i32: 1>} : vector<1x256xi32>
    %c16_i32 = arith.constant 16 : i32
    %c0_i32 = arith.constant 0 : i32
    %17 = arith.cmpi eq, %c16_i32, %c0_i32 : i32
    %c1_i32 = arith.constant 1 : i32
    %18 = arith.select %17, %c1_i32, %c16_i32 : i32
    %19 = vector.broadcast %18 : i32 to vector<1x256xi32>
    %20 = arith.remsi %16, %19 : vector<1x256xi32>
    %c0_i32_8 = arith.constant 0 : i32
    %21 = vector.broadcast %c0_i32_8 : i32 to vector<1x256xi32>
    %22 = arith.cmpi ne, %20, %21 : vector<1x256xi32>
    %c0_i32_9 = arith.constant 0 : i32
    %23 = vector.broadcast %c0_i32_9 : i32 to vector<1x256xi32>
    %24 = arith.cmpi slt, %20, %23 : vector<1x256xi32>
    %c0_i32_10 = arith.constant 0 : i32
    %25 = arith.cmpi slt, %18, %c0_i32_10 : i32
    %26 = vector.broadcast %25 : i1 to vector<1x256xi1>
    %27 = vector.broadcast %26 : vector<1x256xi1> to vector<1x256xi1>
    %28 = arith.xori %24, %27 : vector<1x256xi1>
    %29 = arith.andi %28, %22 : vector<1x256xi1>
    %30 = vector.broadcast %18 : i32 to vector<1x256xi32>
    %31 = arith.addi %20, %30 : vector<1x256xi32>
    %32 = arith.select %29, %31, %20 : vector<1x256xi1>, vector<1x256xi32>
    %c1_i32_11 = arith.constant 1 : i32
    %33 = vector.broadcast %c1_i32_11 : i32 to vector<1x256xi32>
    %34 = arith.cmpi sge, %32, %33 : vector<1x256xi32>
    %c15_i32 = arith.constant 15 : i32
    %35 = vector.broadcast %c15_i32 : i32 to vector<1x256xi32>
    %36 = arith.cmpi slt, %32, %35 : vector<1x256xi32>
    %c0_12 = arith.constant 0 : index
    %37 = memref.load %arg2[%c0_12] : memref<1xf32, #tpu.memory_space<smem>>
    %38 = vector.broadcast %37 : f32 to vector<2x256xf32>
    %cst_13 = arith.constant 0.000000e+00 : f32
    %39 = vector.broadcast %cst_13 : f32 to vector<2x17xf32>
    %40 = vector.extract_strided_slice %15 {offsets = [0, 0], sizes = [2, 239], strides = [1, 1]} : vector<2x256xf32> to vector<2x239xf32>
    %41 = tpu.concatenate %39, %40 in 1 : vector<2x17xf32>, vector<2x239xf32> -> vector<2x256xf32>
    %cst_14 = arith.constant 0.000000e+00 : f32
    %42 = vector.broadcast %cst_14 : f32 to vector<2x17xf32>
    %43 = vector.extract_strided_slice %13 {offsets = [0, 0], sizes = [2, 239], strides = [1, 1]} : vector<2x256xf32> to vector<2x239xf32>
    %44 = tpu.concatenate %42, %43 in 1 : vector<2x17xf32>, vector<2x239xf32> -> vector<2x256xf32>
    %cst_15 = arith.constant 0.000000e+00 : f32
    %45 = vector.shape_cast %34 : vector<1x256xi1> to vector<1x256xi1>
    %46 = vector.broadcast %45 : vector<1x256xi1> to vector<2x256xi1>
    %47 = vector.broadcast %cst_15 : f32 to vector<2x256xf32>
    %48 = arith.select %46, %41, %47 : vector<2x256xi1>, vector<2x256xf32>
    %cst_16 = arith.constant 0.000000e+00 : f32
    %49 = vector.shape_cast %34 : vector<1x256xi1> to vector<1x256xi1>
    %50 = vector.broadcast %49 : vector<1x256xi1> to vector<2x256xi1>
    %51 = vector.broadcast %cst_16 : f32 to vector<2x256xf32>
    %52 = arith.select %50, %44, %51 : vector<2x256xi1>, vector<2x256xf32>
    %c0_17 = arith.constant 0 : index
    %53 = memref.load %arg1[%c0_17] : memref<18xf32, #tpu.memory_space<smem>>
    %c9 = arith.constant 9 : index
    %54 = memref.load %arg1[%c9] : memref<18xf32, #tpu.memory_space<smem>>
    %55 = vector.broadcast %53 : f32 to vector<2x256xf32>
    %56 = arith.mulf %55, %48 : vector<2x256xf32>
    %57 = arith.addf %38, %56 : vector<2x256xf32>
    %58 = vector.broadcast %54 : f32 to vector<2x256xf32>
    %59 = arith.mulf %58, %52 : vector<2x256xf32>
    %60 = arith.addf %57, %59 : vector<2x256xf32>
    %cst_18 = arith.constant 0.000000e+00 : f32
    %61 = vector.broadcast %cst_18 : f32 to vector<2x16xf32>
    %62 = vector.extract_strided_slice %15 {offsets = [0, 0], sizes = [2, 240], strides = [1, 1]} : vector<2x256xf32> to vector<2x240xf32>
    %63 = tpu.concatenate %61, %62 in 1 : vector<2x16xf32>, vector<2x240xf32> -> vector<2x256xf32>
    %cst_19 = arith.constant 0.000000e+00 : f32
    %64 = vector.broadcast %cst_19 : f32 to vector<2x16xf32>
    %65 = vector.extract_strided_slice %13 {offsets = [0, 0], sizes = [2, 240], strides = [1, 1]} : vector<2x256xf32> to vector<2x240xf32>
    %66 = tpu.concatenate %64, %65 in 1 : vector<2x16xf32>, vector<2x240xf32> -> vector<2x256xf32>
    %c1_20 = arith.constant 1 : index
    %67 = memref.load %arg1[%c1_20] : memref<18xf32, #tpu.memory_space<smem>>
    %c10 = arith.constant 10 : index
    %68 = memref.load %arg1[%c10] : memref<18xf32, #tpu.memory_space<smem>>
    %69 = vector.broadcast %67 : f32 to vector<2x256xf32>
    %70 = arith.mulf %69, %63 : vector<2x256xf32>
    %71 = arith.addf %60, %70 : vector<2x256xf32>
    %72 = vector.broadcast %68 : f32 to vector<2x256xf32>
    %73 = arith.mulf %72, %66 : vector<2x256xf32>
    %74 = arith.addf %71, %73 : vector<2x256xf32>
    %cst_21 = arith.constant 0.000000e+00 : f32
    %75 = vector.broadcast %cst_21 : f32 to vector<2x15xf32>
    %76 = vector.extract_strided_slice %15 {offsets = [0, 0], sizes = [2, 241], strides = [1, 1]} : vector<2x256xf32> to vector<2x241xf32>
    %77 = tpu.concatenate %75, %76 in 1 : vector<2x15xf32>, vector<2x241xf32> -> vector<2x256xf32>
    %cst_22 = arith.constant 0.000000e+00 : f32
    %78 = vector.broadcast %cst_22 : f32 to vector<2x15xf32>
    %79 = vector.extract_strided_slice %13 {offsets = [0, 0], sizes = [2, 241], strides = [1, 1]} : vector<2x256xf32> to vector<2x241xf32>
    %80 = tpu.concatenate %78, %79 in 1 : vector<2x15xf32>, vector<2x241xf32> -> vector<2x256xf32>
    %cst_23 = arith.constant 0.000000e+00 : f32
    %81 = vector.shape_cast %36 : vector<1x256xi1> to vector<1x256xi1>
    %82 = vector.broadcast %81 : vector<1x256xi1> to vector<2x256xi1>
    %83 = vector.broadcast %cst_23 : f32 to vector<2x256xf32>
    %84 = arith.select %82, %77, %83 : vector<2x256xi1>, vector<2x256xf32>
    %cst_24 = arith.constant 0.000000e+00 : f32
    %85 = vector.shape_cast %36 : vector<1x256xi1> to vector<1x256xi1>
    %86 = vector.broadcast %85 : vector<1x256xi1> to vector<2x256xi1>
    %87 = vector.broadcast %cst_24 : f32 to vector<2x256xf32>
    %88 = arith.select %86, %80, %87 : vector<2x256xi1>, vector<2x256xf32>
    %c2_25 = arith.constant 2 : index
    %89 = memref.load %arg1[%c2_25] : memref<18xf32, #tpu.memory_space<smem>>
    %c11 = arith.constant 11 : index
    %90 = memref.load %arg1[%c11] : memref<18xf32, #tpu.memory_space<smem>>
    %91 = vector.broadcast %89 : f32 to vector<2x256xf32>
    %92 = arith.mulf %91, %84 : vector<2x256xf32>
    %93 = arith.addf %74, %92 : vector<2x256xf32>
    %94 = vector.broadcast %90 : f32 to vector<2x256xf32>
    %95 = arith.mulf %94, %88 : vector<2x256xf32>
    %96 = arith.addf %93, %95 : vector<2x256xf32>
    %cst_26 = arith.constant 0.000000e+00 : f32
    %97 = vector.broadcast %cst_26 : f32 to vector<2x1xf32>
    %98 = vector.extract_strided_slice %15 {offsets = [0, 0], sizes = [2, 255], strides = [1, 1]} : vector<2x256xf32> to vector<2x255xf32>
    %99 = tpu.concatenate %97, %98 in 1 : vector<2x1xf32>, vector<2x255xf32> -> vector<2x256xf32>
    %cst_27 = arith.constant 0.000000e+00 : f32
    %100 = vector.broadcast %cst_27 : f32 to vector<2x1xf32>
    %101 = vector.extract_strided_slice %13 {offsets = [0, 0], sizes = [2, 255], strides = [1, 1]} : vector<2x256xf32> to vector<2x255xf32>
    %102 = tpu.concatenate %100, %101 in 1 : vector<2x1xf32>, vector<2x255xf32> -> vector<2x256xf32>
    %cst_28 = arith.constant 0.000000e+00 : f32
    %103 = vector.shape_cast %34 : vector<1x256xi1> to vector<1x256xi1>
    %104 = vector.broadcast %103 : vector<1x256xi1> to vector<2x256xi1>
    %105 = vector.broadcast %cst_28 : f32 to vector<2x256xf32>
    %106 = arith.select %104, %99, %105 : vector<2x256xi1>, vector<2x256xf32>
    %cst_29 = arith.constant 0.000000e+00 : f32
    %107 = vector.shape_cast %34 : vector<1x256xi1> to vector<1x256xi1>
    %108 = vector.broadcast %107 : vector<1x256xi1> to vector<2x256xi1>
    %109 = vector.broadcast %cst_29 : f32 to vector<2x256xf32>
    %110 = arith.select %108, %102, %109 : vector<2x256xi1>, vector<2x256xf32>
    %c3_30 = arith.constant 3 : index
    %111 = memref.load %arg1[%c3_30] : memref<18xf32, #tpu.memory_space<smem>>
    %c12 = arith.constant 12 : index
    %112 = memref.load %arg1[%c12] : memref<18xf32, #tpu.memory_space<smem>>
    %113 = vector.broadcast %111 : f32 to vector<2x256xf32>
    %114 = arith.mulf %113, %106 : vector<2x256xf32>
    %115 = arith.addf %96, %114 : vector<2x256xf32>
    %116 = vector.broadcast %112 : f32 to vector<2x256xf32>
    %117 = arith.mulf %116, %110 : vector<2x256xf32>
    %118 = arith.addf %115, %117 : vector<2x256xf32>
    %c4 = arith.constant 4 : index
    %119 = memref.load %arg1[%c4] : memref<18xf32, #tpu.memory_space<smem>>
    %c13 = arith.constant 13 : index
    %120 = memref.load %arg1[%c13] : memref<18xf32, #tpu.memory_space<smem>>
    %121 = vector.broadcast %119 : f32 to vector<2x256xf32>
    %122 = arith.mulf %121, %15 : vector<2x256xf32>
    %123 = arith.addf %118, %122 : vector<2x256xf32>
    %124 = vector.broadcast %120 : f32 to vector<2x256xf32>
    %125 = arith.mulf %124, %13 : vector<2x256xf32>
    %126 = arith.addf %123, %125 : vector<2x256xf32>
    %cst_31 = arith.constant 0.000000e+00 : f32
    %127 = vector.broadcast %cst_31 : f32 to vector<2x1xf32>
    %128 = vector.extract_strided_slice %15 {offsets = [0, 1], sizes = [2, 255], strides = [1, 1]} : vector<2x256xf32> to vector<2x255xf32>
    %129 = tpu.concatenate %128, %127 in 1 : vector<2x255xf32>, vector<2x1xf32> -> vector<2x256xf32>
    %cst_32 = arith.constant 0.000000e+00 : f32
    %130 = vector.broadcast %cst_32 : f32 to vector<2x1xf32>
    %131 = vector.extract_strided_slice %13 {offsets = [0, 1], sizes = [2, 255], strides = [1, 1]} : vector<2x256xf32> to vector<2x255xf32>
    %132 = tpu.concatenate %131, %130 in 1 : vector<2x255xf32>, vector<2x1xf32> -> vector<2x256xf32>
    %cst_33 = arith.constant 0.000000e+00 : f32
    %133 = vector.shape_cast %36 : vector<1x256xi1> to vector<1x256xi1>
    %134 = vector.broadcast %133 : vector<1x256xi1> to vector<2x256xi1>
    %135 = vector.broadcast %cst_33 : f32 to vector<2x256xf32>
    %136 = arith.select %134, %129, %135 : vector<2x256xi1>, vector<2x256xf32>
    %cst_34 = arith.constant 0.000000e+00 : f32
    %137 = vector.shape_cast %36 : vector<1x256xi1> to vector<1x256xi1>
    %138 = vector.broadcast %137 : vector<1x256xi1> to vector<2x256xi1>
    %139 = vector.broadcast %cst_34 : f32 to vector<2x256xf32>
    %140 = arith.select %138, %132, %139 : vector<2x256xi1>, vector<2x256xf32>
    %c5 = arith.constant 5 : index
    %141 = memref.load %arg1[%c5] : memref<18xf32, #tpu.memory_space<smem>>
    %c14 = arith.constant 14 : index
    %142 = memref.load %arg1[%c14] : memref<18xf32, #tpu.memory_space<smem>>
    %143 = vector.broadcast %141 : f32 to vector<2x256xf32>
    %144 = arith.mulf %143, %136 : vector<2x256xf32>
    %145 = arith.addf %126, %144 : vector<2x256xf32>
    %146 = vector.broadcast %142 : f32 to vector<2x256xf32>
    %147 = arith.mulf %146, %140 : vector<2x256xf32>
    %148 = arith.addf %145, %147 : vector<2x256xf32>
    %cst_35 = arith.constant 0.000000e+00 : f32
    %149 = vector.broadcast %cst_35 : f32 to vector<2x15xf32>
    %150 = vector.extract_strided_slice %15 {offsets = [0, 15], sizes = [2, 241], strides = [1, 1]} : vector<2x256xf32> to vector<2x241xf32>
    %151 = tpu.concatenate %150, %149 in 1 : vector<2x241xf32>, vector<2x15xf32> -> vector<2x256xf32>
    %cst_36 = arith.constant 0.000000e+00 : f32
    %152 = vector.broadcast %cst_36 : f32 to vector<2x15xf32>
    %153 = vector.extract_strided_slice %13 {offsets = [0, 15], sizes = [2, 241], strides = [1, 1]} : vector<2x256xf32> to vector<2x241xf32>
    %154 = tpu.concatenate %153, %152 in 1 : vector<2x241xf32>, vector<2x15xf32> -> vector<2x256xf32>
    %cst_37 = arith.constant 0.000000e+00 : f32
    %155 = vector.shape_cast %34 : vector<1x256xi1> to vector<1x256xi1>
    %156 = vector.broadcast %155 : vector<1x256xi1> to vector<2x256xi1>
    %157 = vector.broadcast %cst_37 : f32 to vector<2x256xf32>
    %158 = arith.select %156, %151, %157 : vector<2x256xi1>, vector<2x256xf32>
    %cst_38 = arith.constant 0.000000e+00 : f32
    %159 = vector.shape_cast %34 : vector<1x256xi1> to vector<1x256xi1>
    %160 = vector.broadcast %159 : vector<1x256xi1> to vector<2x256xi1>
    %161 = vector.broadcast %cst_38 : f32 to vector<2x256xf32>
    %162 = arith.select %160, %154, %161 : vector<2x256xi1>, vector<2x256xf32>
    %c6 = arith.constant 6 : index
    %163 = memref.load %arg1[%c6] : memref<18xf32, #tpu.memory_space<smem>>
    %c15 = arith.constant 15 : index
    %164 = memref.load %arg1[%c15] : memref<18xf32, #tpu.memory_space<smem>>
    %165 = vector.broadcast %163 : f32 to vector<2x256xf32>
    %166 = arith.mulf %165, %158 : vector<2x256xf32>
    %167 = arith.addf %148, %166 : vector<2x256xf32>
    %168 = vector.broadcast %164 : f32 to vector<2x256xf32>
    %169 = arith.mulf %168, %162 : vector<2x256xf32>
    %170 = arith.addf %167, %169 : vector<2x256xf32>
    %cst_39 = arith.constant 0.000000e+00 : f32
    %171 = vector.broadcast %cst_39 : f32 to vector<2x16xf32>
    %172 = vector.extract_strided_slice %15 {offsets = [0, 16], sizes = [2, 240], strides = [1, 1]} : vector<2x256xf32> to vector<2x240xf32>
    %173 = tpu.concatenate %172, %171 in 1 : vector<2x240xf32>, vector<2x16xf32> -> vector<2x256xf32>
    %cst_40 = arith.constant 0.000000e+00 : f32
    %174 = vector.broadcast %cst_40 : f32 to vector<2x16xf32>
    %175 = vector.extract_strided_slice %13 {offsets = [0, 16], sizes = [2, 240], strides = [1, 1]} : vector<2x256xf32> to vector<2x240xf32>
    %176 = tpu.concatenate %175, %174 in 1 : vector<2x240xf32>, vector<2x16xf32> -> vector<2x256xf32>
    %c7 = arith.constant 7 : index
    %177 = memref.load %arg1[%c7] : memref<18xf32, #tpu.memory_space<smem>>
    %c16 = arith.constant 16 : index
    %178 = memref.load %arg1[%c16] : memref<18xf32, #tpu.memory_space<smem>>
    %179 = vector.broadcast %177 : f32 to vector<2x256xf32>
    %180 = arith.mulf %179, %173 : vector<2x256xf32>
    %181 = arith.addf %170, %180 : vector<2x256xf32>
    %182 = vector.broadcast %178 : f32 to vector<2x256xf32>
    %183 = arith.mulf %182, %176 : vector<2x256xf32>
    %184 = arith.addf %181, %183 : vector<2x256xf32>
    %cst_41 = arith.constant 0.000000e+00 : f32
    %185 = vector.broadcast %cst_41 : f32 to vector<2x17xf32>
    %186 = vector.extract_strided_slice %15 {offsets = [0, 17], sizes = [2, 239], strides = [1, 1]} : vector<2x256xf32> to vector<2x239xf32>
    %187 = tpu.concatenate %186, %185 in 1 : vector<2x239xf32>, vector<2x17xf32> -> vector<2x256xf32>
    %cst_42 = arith.constant 0.000000e+00 : f32
    %188 = vector.broadcast %cst_42 : f32 to vector<2x17xf32>
    %189 = vector.extract_strided_slice %13 {offsets = [0, 17], sizes = [2, 239], strides = [1, 1]} : vector<2x256xf32> to vector<2x239xf32>
    %190 = tpu.concatenate %189, %188 in 1 : vector<2x239xf32>, vector<2x17xf32> -> vector<2x256xf32>
    %cst_43 = arith.constant 0.000000e+00 : f32
    %191 = vector.shape_cast %36 : vector<1x256xi1> to vector<1x256xi1>
    %192 = vector.broadcast %191 : vector<1x256xi1> to vector<2x256xi1>
    %193 = vector.broadcast %cst_43 : f32 to vector<2x256xf32>
    %194 = arith.select %192, %187, %193 : vector<2x256xi1>, vector<2x256xf32>
    %cst_44 = arith.constant 0.000000e+00 : f32
    %195 = vector.shape_cast %36 : vector<1x256xi1> to vector<1x256xi1>
    %196 = vector.broadcast %195 : vector<1x256xi1> to vector<2x256xi1>
    %197 = vector.broadcast %cst_44 : f32 to vector<2x256xf32>
    %198 = arith.select %196, %190, %197 : vector<2x256xi1>, vector<2x256xf32>
    %c8 = arith.constant 8 : index
    %199 = memref.load %arg1[%c8] : memref<18xf32, #tpu.memory_space<smem>>
    %c17 = arith.constant 17 : index
    %200 = memref.load %arg1[%c17] : memref<18xf32, #tpu.memory_space<smem>>
    %201 = vector.broadcast %199 : f32 to vector<2x256xf32>
    %202 = arith.mulf %201, %194 : vector<2x256xf32>
    %203 = arith.addf %184, %202 : vector<2x256xf32>
    %204 = vector.broadcast %200 : f32 to vector<2x256xf32>
    %205 = arith.mulf %204, %198 : vector<2x256xf32>
    %206 = arith.addf %203, %205 : vector<2x256xf32>
    %207 = arith.negf %206 : vector<2x256xf32>
    %208 = math.exp %207 : vector<2x256xf32>
    %cst_45 = arith.constant 1.000000e+00 : f32
    %209 = vector.broadcast %cst_45 : f32 to vector<2x256xf32>
    %210 = arith.addf %209, %208 : vector<2x256xf32>
    %211 = arith.divf %209, %210 : vector<2x256xf32>
    %c0_46 = arith.constant 0 : index
    %c0_47 = arith.constant 0 : index
    %212 = vector.load %arg4[%c0_46, %c0_47] : memref<2x256xf32, #tpu.memory_space<vmem>>, vector<2x256xf32>
    tpu.vector_store %arg4[%c0_46, %c0_47], %211 {strides = array<i32>} : memref<2x256xf32, #tpu.memory_space<vmem>>, vector<2x256xf32>,
    return
  }
  func.func @transform_0(%arg0: i32, %arg1: memref<18xf32, #tpu.memory_space<smem>>, %arg2: memref<1xf32, #tpu.memory_space<smem>>) -> (i32, i32, i32) {
    %c0_i32 = arith.constant 0 : i32
    %c0_i32_0 = arith.constant 0 : i32
    %c0_i32_1 = arith.constant 0 : i32
    return %arg0, %c0_i32, %c0_i32_0 : i32, i32, i32
  }
  func.func @transform_1(%arg0: i32, %arg1: memref<18xf32, #tpu.memory_space<smem>>, %arg2: memref<1xf32, #tpu.memory_space<smem>>) -> (i32, i32) {
    %c0_i32 = arith.constant 0 : i32
    %c0_i32_0 = arith.constant 0 : i32
    return %arg0, %c0_i32 : i32, i32
  }
}

</mosaic_0001>

<bundles_post_ra>
// kernel: tpu_custom_call.1
= control target key start
LH: loop header
LB: loop body
LE: loop exit
PB: predicated region body
PF: predicated region fallthrough
CT: control target
= control target key end

     0   :  { %s644_s15 = smov [#allocation3]   ;;  %s883_s0 = inlined_call_operand.vmem [shape: f32[18], index: 0, kind: input, shape index: {}]   ;;  %s884_s1 = inlined_call_operand.<no memory space> [shape: f32[1], index: 1, kind: input, shape index: {}]   ;;  %s885_s2 = inlined_call_operand.hbm [shape: f32[2,4,256], index: 2, kind: input, shape index: {}]   ;;  %s886_s3 = inlined_call_operand.hbm [shape: f32[2,256], index: 3, kind: output, shape index: {}]  }
   0x1   :  { %s9_s14 = sshll.u32 %s883_s0, 4  ;;  %s10_s14 = int_to_ptr.vmem [resolvable:$true] %s9_s14 }
   0x2   :  { %12 = dma.vmem_to_smem %s10_s14, 16, %s644_s15, [#allocation2] }
   0x3   :  { %638 = dma.done.wait [#allocation2], 16 }
   0x4   :  { %639 = vsyncadd [#allocation2], 4294967280 }
   0x5   :  { %16 = sfence }
   0x6   :  { %17 = vsyncpa [#allocation6], 0 }
   0x7   :  { %18 = vsyncpa [#allocation7], 0  ;;  %s23_s18 = sshll.u32 %s885_s2, 4  ;;  %s645_s19 = smov [#allocation5]   ;;  %s24_s18 = int_to_ptr.hbm [resolvable:$true] %s23_s18 }
   0x8   :  { %s25_s20 = sshll.u32 %s645_s19, 4  ;;  %s646_s21 = smov 128   ;;  %s26_s20 = int_to_ptr.vmem [resolvable:$true] %s25_s20 }
   0x9   :  { %s647_s22 = smov 8  }
   0xa   :  { %31 = dma.hbm_to_vmem [thread:$0]  %s24_s18, 256, %s26_s20, [#allocation6], %s646_s21, %s646_s21, %s647_s22  }
   0xb   :  { %640 = dma.done.wait [#allocation6], 256  }
   0xc   :  { %641 = vsyncadd [#allocation6], 4294967040  ;;  %v36_v0 = vld [vmem:[#allocation5] ss:$4 sm:$0x3]  ;;  %s648_s0 = smov 17  }
   0xd   :  { %v38_v1 = vld [vmem:[#allocation5 + $0x8] ss:$4 sm:$0x3]  ;;  %v40_v2 = vld [vmem:[#allocation5 + $0x1] ss:$4 sm:$0x3] }
   0xe   :  { %v42_v3 = vld [vmem:[#allocation5 + $0x9] ss:$4 sm:$0x3]  ;;  %v43_v4 = vadd.f32 %v40_v2, %v36_v0  ;;  %v48_v6 = vld [vmem:[#allocation5 + $0x2] ss:$4 sm:$0x3]  ;;  %v45_v14 = vmax.f32 %v36_v0, %v40_v2 }
   0xf   :  { %v44_v5 = vadd.f32 %v42_v3, %v38_v1  ;;  %v50_v7 = vld [vmem:[#allocation5 + $0xa] ss:$4 sm:$0x3]  ;;  %v56_v8 = vld [vmem:[#allocation5 + $0x3] ss:$4 sm:$0x3]  ;;  %v46_v17 = vmax.f32 %v38_v1, %v42_v3 }
  0x10   :  { %v58_v9 = vld [vmem:[#allocation5 + $0xb] ss:$4 sm:$0x3]  ;;  %v51_v10 = vadd.f32 %v48_v6, %v43_v4  ;;  %v53_v18 = vmax.f32 %v45_v14, %v48_v6  ;;  %s649_s2 = smov 16   ;;  %s650_s23 = smov 15   ;;  %v65_v6 = vlaneseq  ;;  %vm109_vm0 = vcmask 138240  }
  0x11   :  { %v52_v11 = vadd.f32 %v50_v7, %v44_v5  ;;  %v54_v19 = vmax.f32 %v46_v17, %v50_v7  ;;  %s545_s24 = sld [smem:[#allocation3 + $0x4]]  ;;  %s651_s25 = smov 1   ;;  %vm158_vm3 = vcmask 130048   ;;  %vm197_vm4 = vcmask 121856  }
  0x12   :  { %v59_v12 = vadd.f32 %v56_v8, %v51_v10  ;;  %v689_v20 = vmax.f32 %v53_v18, %v56_v8  ;;  %s546_s26 = sld [smem:[#allocation3 + $0xd]]  ;;  %s652_s27 = smov 127   ;;  %v66_v8 = vand.u32 127, %v65_v6  ;;  %vm244_vm7 = vcmask 7168  }
  0x13   :  { %v60_v13 = vadd.f32 %v58_v9, %v52_v11  ;;  %v691_v21 = vmax.f32 %v54_v19, %v58_v9  ;;  %s653_s28 = smov 113   ;;  %s654_s29 = smov 112   ;;  %vm317_vm8 = vcmask 1039360   ;;  %vm360_vm9 = vcmask 924672  }
  0x14   :  { %v683_v15 = vmul.f32 0.25, %v59_v12  ;;  %s655_s30 = smov 111   ;;  %v67_v10 = vadd.s32 128, %v66_v8  ;;  %s137_s4 = sld [smem:[#allocation3]]  ;;  %v72_v14 = vand.u32 15, %v66_v8  ;;  %vm403_vm10 = vcmask 916480  }
  0x15   :  { %v685_v16 = vmul.f32 0.25, %v60_v13  ;;  %s538_s5 = sld [smem:[#allocation3 + $0x9]]  ;;  %vm442_vm11 = vcmask 908288   ;;  %s656_s21 = smov [#allocation8]  }
  0x16   :  { %100 = vst [vmem:[#allocation1] ss:$9 sm:$0xff] %v683_v15  ;;  %v79_v12 = vand.u32 15, %v67_v10  ;;  %vm739_vm2 = vcmp.ge.s32.totalorder %v72_v14, 1  ;;  %s745_s6 = sld [smem:[#allocation3 + $0x1]]  ;;  %vm775_vm6 = vcmp.lt.s32.totalorder %v72_v14, 15 }
  0x17   :  { %102 = vst [vmem:[#allocation1 + $0x1] ss:$9 sm:$0xff] %v685_v16  ;;  %v280_v36 = vstv %s545_s24  ;;  %s754_s9 = sld [smem:[#allocation3 + $0xa]]  ;;  %s526_s22 = sshll.u32 %s656_s21, 4  ;;  %s527_s22 = int_to_ptr.vmem [resolvable:$true] %s526_s22 }
  0x18   :  { %v281_v37 = vmul.f32 %v280_v36, %v683_v15  ;;  %v282_v38 = vmul.f32 %v280_v36, %v685_v16  ;;  %v294_v41 = vstv %s546_s26  ;;  %vm735_vm1 = vcmp.ge.s32.totalorder %v79_v12, 1  ;;  %s765_s10 = sld [smem:[#allocation3 + $0xb]] }
  0x19   :  { %v295_v42 = vmul.f32 %v294_v41, %v689_v20  ;;  %v296_v43 = vmul.f32 %v294_v41, %v691_v21  ;;  %vm769_vm5 = vcmp.lt.s32.totalorder %v79_v12, 15  ;;  %s783_s11 = sld [smem:[#allocation3 + $0x3]] }
  0x1a   :  { %s792_s12 = sld [smem:[#allocation3 + $0xc]] }
  0x1b   :  { %s810_s13 = sld [smem:[#allocation3 + $0x5]] }
  0x1c   :  { %v178_v36 = vstv %s745_s6  ;;  %s812_s14 = sld [smem:[#allocation3 + $0xe]] }
  0x1d   :  { %s816_s15 = sld [smem:[#allocation3 + $0x6]] }
  0x1e   :  { %v103_v22 = vld [vmem:[#allocation1] sm:$0xff]  ;;  %v104_v23 = vld [vmem:[#allocation1 + $0x9] sm:$0xff]  ;;  %s822_s16 = sld [smem:[#allocation3 + $0xf]] }
  0x1f   :  { %105 = vrot.lane.b32.xlu0 %v103_v22, %s648_s0  ;;  %116 = vst [vmem:[#allocation1] ss:$9 sm:$0xff] %v689_v20  ;;  %s831_s17 = sld [smem:[#allocation3 + $0x7]] }
  0x20   :  { %118 = vst [vmem:[#allocation1 + $0x1] ss:$9 sm:$0xff] %v691_v21  ;;  %s846_s18 = sld [smem:[#allocation3 + $0x10]] }
  0x21   :  { %s854_s19 = sld [smem:[#allocation3 + $0x8]] }
  0x22   :  { %s861_s20 = sld [smem:[#allocation3 + $0x11]] }
  0x27   :  { %v119_v24 = vld [vmem:[#allocation1] sm:$0xff]  ;;  %107 = vrot.lane.b32.xlu0 %v104_v23, %s648_s0  ;;  %v120_v25 = vld [vmem:[#allocation1 + $0x9] sm:$0xff] }
  0x28   :  { %121 = vrot.lane.b32.xlu1 %v119_v24, %s648_s0  ;;  %149 = vst [vmem:[#allocation1] ss:$9 sm:$0xff] %v683_v15 }
  0x29   :  { %151 = vst [vmem:[#allocation1 + $0x1] ss:$9 sm:$0xff] %v685_v16 }
  0x30   :  { %123 = vrot.lane.b32.xlu1 %v120_v25, %s648_s0  ;;  %v152_v26 = vld [vmem:[#allocation1] sm:$0xff]  ;;  %v153_v27 = vld [vmem:[#allocation1 + $0x9] sm:$0xff] }
  0x31   :  { %163 = vst [vmem:[#allocation1] ss:$9 sm:$0xff] %v689_v20  ;;  %154 = vrot.lane.b32.xlu2 %v152_v26, %s649_s2 }
  0x32   :  { %165 = vst [vmem:[#allocation1 + $0x1] ss:$9 sm:$0xff] %v691_v21 }
  0x39   :  { %v166_v28 = vld [vmem:[#allocation1] sm:$0xff]  ;;  %v167_v29 = vld [vmem:[#allocation1 + $0x9] sm:$0xff]  ;;  %156 = vrot.lane.b32.xlu2 %v153_v27, %s649_s2  ;;  %v97_v27 = vstv %s884_s1  ;;  %s760_s1 = sld [smem:[#allocation3 + $0x2]] }
  0x3a   :  { %168 = vrot.lane.b32.xlu0 %v166_v28, %s649_s2  ;;  %170 = vrot.lane.b32.xlu1 %v167_v29, %s649_s2  ;;  %188 = vst [vmem:[#allocation1] ss:$9 sm:$0xff] %v683_v15  ;;  %v144_v28 = vstv %s538_s5 }
  0x3b   :  { %190 = vst [vmem:[#allocation1 + $0x1] ss:$9 sm:$0xff] %v685_v16 }
  0x42   :  { %v192_v30 = vld [vmem:[#allocation1 + $0x9] sm:$0xff]  ;;  %v191_v31 = vld [vmem:[#allocation1] sm:$0xff] }
  0x43   :  { %195 = vrot.lane.b32.xlu0 %v192_v30, %s650_s23  ;;  %202 = vst [vmem:[#allocation1] ss:$9 sm:$0xff] %v689_v20  ;;  %193 = vrot.lane.b32.xlu2 %v191_v31, %s650_s23 }
  0x44   :  { %204 = vst [vmem:[#allocation1 + $0x1] ss:$9 sm:$0xff] %v691_v21 }
  0x4b   :  { %v205_v32 = vld [vmem:[#allocation1] sm:$0xff]  ;;  %v206_v33 = vld [vmem:[#allocation1 + $0x9] sm:$0xff] }
  0x4c   :  { %207 = vrot.lane.b32.xlu1 %v205_v32, %s650_s23  ;;  %235 = vst [vmem:[#allocation1] ss:$9 sm:$0xff] %v683_v15  ;;  %209 = vrot.lane.b32.xlu2 %v206_v33, %s650_s23  ;;  %s528_s23 = sshll.u32 %s886_s3, 4  ;;  %s529_s23 = int_to_ptr.hbm [resolvable:$true] %s528_s23 }
  0x4d   :  { %237 = vst [vmem:[#allocation1 + $0x1] ss:$9 sm:$0xff] %v685_v16 }
  0x54   :  { %v238_v34 = vld [vmem:[#allocation1] sm:$0xff]  ;;  %v239_v35 = vld [vmem:[#allocation1 + $0x9] sm:$0xff] }
  0x55   :  { %240 = vrot.lane.b32.xlu0 %v238_v34, %s651_s25  ;;  %242 = vrot.lane.b32.xlu1 %v239_v35, %s651_s25  ;;  %249 = vst [vmem:[#allocation1] ss:$9 sm:$0xff] %v689_v20 }
  0x56   :  { %251 = vst [vmem:[#allocation1 + $0x1] ss:$9 sm:$0xff] %v691_v21 }
  0x5d   :  { %v253_v39 = vld [vmem:[#allocation1 + $0x9] sm:$0xff]  ;;  %v252_v40 = vld [vmem:[#allocation1] sm:$0xff] }
  0x5e   :  { %256 = vrot.lane.b32.xlu0 %v253_v39, %s651_s25  ;;  %285 = vst [vmem:[#allocation1] ss:$9 sm:$0xff] %v281_v37  ;;  %254 = vrot.lane.b32.xlu2 %v252_v40, %s651_s25 }
  0x5f   :  { %287 = vst [vmem:[#allocation1 + $0x1] ss:$9 sm:$0xff] %v282_v38 }
  0x66   :  { %v711_v44 = vld [vmem:[#allocation1] sm:$0xff]  ;;  %v713_v45 = vld [vmem:[#allocation1 + $0x9] sm:$0xff] }
  0x67   :  { %299 = vst [vmem:[#allocation1] ss:$9 sm:$0xff] %v295_v42 }
  0x68   :  { %301 = vst [vmem:[#allocation1 + $0x1] ss:$9 sm:$0xff] %v296_v43 }
  0x6f   :  { %v715_v46 = vld [vmem:[#allocation1] sm:$0xff]  ;;  %v717_v47 = vld [vmem:[#allocation1 + $0x9] sm:$0xff] }
  0x70   :  { %308 = vst [vmem:[#allocation1] ss:$9 sm:$0xff] %v683_v15 }
  0x71   :  { %310 = vst [vmem:[#allocation1 + $0x1] ss:$9 sm:$0xff] %v685_v16 }
  0x78   :  { %v312_v48 = vld [vmem:[#allocation1 + $0x9] sm:$0xff]  ;;  %v311_v49 = vld [vmem:[#allocation1] sm:$0xff] }
  0x79   :  { %315 = vrot.lane.b32.xlu1 %v312_v48, %s652_s27  ;;  %322 = vst [vmem:[#allocation1] ss:$9 sm:$0xff] %v689_v20  ;;  %313 = vrot.lane.b32.xlu2 %v311_v49, %s652_s27  ;;  %v183_v48 = vstv %s754_s9 }
  0x7a   :  { %324 = vst [vmem:[#allocation1 + $0x1] ss:$9 sm:$0xff] %v691_v21 }
  0x81   :  { %v326_v50 = vld [vmem:[#allocation1 + $0x9] sm:$0xff]  ;;  %v325_v51 = vld [vmem:[#allocation1] sm:$0xff] }
  0x82   :  { %329 = vrot.lane.b32.xlu0 %v326_v50, %s652_s27  ;;  %327 = vrot.lane.b32.xlu1 %v325_v51, %s652_s27  ;;  %351 = vst [vmem:[#allocation1] ss:$9 sm:$0xff] %v683_v15 }
  0x83   :  { %353 = vst [vmem:[#allocation1 + $0x1] ss:$9 sm:$0xff] %v685_v16 }
  0x8a   :  { %v354_v52 = vld [vmem:[#allocation1] sm:$0xff]  ;;  %v355_v53 = vld [vmem:[#allocation1 + $0x9] sm:$0xff] }
  0x8b   :  { %356 = vrot.lane.b32.xlu0 %v354_v52, %s653_s28  ;;  %365 = vst [vmem:[#allocation1] ss:$9 sm:$0xff] %v689_v20  ;;  %358 = vrot.lane.b32.xlu2 %v355_v53, %s653_s28  ;;  %v155_v2 = vpop.permute.xlu2 %154 }
  0x8c   :  { %367 = vst [vmem:[#allocation1 + $0x1] ss:$9 sm:$0xff] %v691_v21  ;;  %v162_v41 = vsel %vm158_vm3, 0.0, %v155_v2 }
  0x8d   :  { %v179_v52 = vmul.f32 %v178_v36, %v162_v41 }
  0x91   :  { %v106_v1 = vpop.permute.xlu0 %105 }
  0x92   :  { %v113_v19 = vsel %vm109_vm0, 0.0, %v106_v1 }
  0x93   :  { %v368_v54 = vld [vmem:[#allocation1] sm:$0xff]  ;;  %v369_v55 = vld [vmem:[#allocation1 + $0x9] sm:$0xff]  ;;  %v157_v5 = vpop.permute.xlu2 %156  ;;  %v133_v24 = vsel %vm739_vm2, %v113_v19, 0.0 }
  0x94   :  { %372 = vrot.lane.b32.xlu1 %v369_v55, %s653_s28  ;;  %394 = vst [vmem:[#allocation1] ss:$9 sm:$0xff] %v683_v15  ;;  %370 = vrot.lane.b32.xlu2 %v368_v54, %s653_s28  ;;  %v159_v37 = vsel %vm158_vm3, %v155_v2, %v157_v5 }
  0x95   :  { %396 = vst [vmem:[#allocation1 + $0x1] ss:$9 sm:$0xff] %v685_v16  ;;  %v180_v43 = vmul.f32 %v178_v36, %v159_v37 }
  0x99   :  { %v108_v4 = vpop.permute.xlu0 %107 }
  0x9a   :  { %v122_v0 = vpop.permute.xlu1 %121  ;;  %v110_v17 = vsel %vm109_vm0, %v106_v1, %v108_v4 }
  0x9b   :  { %v134_v22 = vsel %vm735_vm1, %v110_v17, 0.0  ;;  %v128_v25 = vsel %vm109_vm0, 0.0, %v122_v0 }
  0x9c   :  { %v398_v56 = vld [vmem:[#allocation1 + $0x9] sm:$0xff]  ;;  %v397_v57 = vld [vmem:[#allocation1] sm:$0xff]  ;;  %v135_v32 = vsel %vm739_vm2, %v128_v25, 0.0 }
  0x9d   :  { %401 = vrot.lane.b32.xlu0 %v398_v56, %s654_s29  ;;  %399 = vrot.lane.b32.xlu1 %v397_v57, %s654_s29  ;;  %408 = vst [vmem:[#allocation1] ss:$9 sm:$0xff] %v689_v20  ;;  %v194_v11 = vpop.permute.xlu2 %193  ;;  %v145_v39 = vmul.f32 %v144_v28, %v135_v32 }
  0x9e   :  { %410 = vst [vmem:[#allocation1 + $0x1] ss:$9 sm:$0xff] %v691_v21 }
  0xa2   :  { %v124_v3 = vpop.permute.xlu1 %123 }
  0xa3   :  { %v125_v23 = vsel %vm109_vm0, %v122_v0, %v124_v3 }
  0xa4   :  { %v136_v29 = vsel %vm735_vm1, %v125_v23, 0.0 }
  0xa5   :  { %v411_v58 = vld [vmem:[#allocation1] sm:$0xff]  ;;  %v412_v59 = vld [vmem:[#allocation1 + $0x9] sm:$0xff]  ;;  %v146_v35 = vmul.f32 %v144_v28, %v136_v29 }
  0xa6   :  { %413 = vrot.lane.b32.xlu1 %v411_v58, %s654_s29  ;;  %433 = vst [vmem:[#allocation1] ss:$9 sm:$0xff] %v683_v15  ;;  %415 = vrot.lane.b32.xlu2 %v412_v59, %s654_s29  ;;  %v201_v59 = vsel %vm197_vm4, 0.0, %v194_v11 }
  0xa7   :  { %435 = vst [vmem:[#allocation1 + $0x1] ss:$9 sm:$0xff] %v685_v16  ;;  %v219_v3 = vsel %vm775_vm6, %v201_v59, 0.0 }
  0xac   :  { %v171_v7 = vpop.permute.xlu1 %170  ;;  %v169_v9 = vpop.permute.xlu0 %168 }
  0xad   :  { %v172_v49 = vsel %vm158_vm3, %v169_v9, %v171_v7  ;;  %v175_v55 = vsel %vm158_vm3, 0.0, %v169_v9  ;;  %v230_v7 = vstv %s765_s10  ;;  %vm517_vm3 = vcmask 1041408  }
  0xae   :  { %v437_v60 = vld [vmem:[#allocation1 + $0x9] sm:$0xff]  ;;  %v436_v61 = vld [vmem:[#allocation1] sm:$0xff]  ;;  %v185_v57 = vmul.f32 %v183_v48, %v172_v49  ;;  %v184_v0 = vmul.f32 %v183_v48, %v175_v55 }
  0xaf   :  { %440 = vrot.lane.b32.xlu0 %v437_v60, %s655_s30  ;;  %447 = vst [vmem:[#allocation1] ss:$9 sm:$0xff] %v689_v20  ;;  %438 = vrot.lane.b32.xlu2 %v436_v61, %s655_s30  ;;  %v210_v20 = vpop.permute.xlu2 %209  ;;  %v225_v60 = vstv %s760_s1 }
  0xb0   :  { %449 = vst [vmem:[#allocation1 + $0x1] ss:$9 sm:$0xff] %v691_v21  ;;  %v139_v21 = vstv %s137_s4  ;;  %v226_v10 = vmul.f32 %v225_v60, %v219_v3  ;;  %v384_v3 = vstv %s816_s15 }
  0xb1   :  { %v141_v26 = vmul.f32 %v139_v21, %v134_v22  ;;  %v140_v31 = vmul.f32 %v139_v21, %v133_v24 }
  0xb3   :  { %v143_v34 = vadd.f32 %v141_v26, %v97_v27  ;;  %v142_v38 = vadd.f32 %v140_v31, %v97_v27 }
  0xb5   :  { %v196_v15 = vpop.permute.xlu0 %195  ;;  %v148_v42 = vadd.f32 %v146_v35, %v143_v34  ;;  %v147_v51 = vadd.f32 %v145_v39, %v142_v38 }
  0xb6   :  { %v198_v54 = vsel %vm197_vm4, %v194_v11, %v196_v15 }
  0xb7   :  { %v451_v62 = vld [vmem:[#allocation1 + $0x9] sm:$0xff]  ;;  %v450_v63 = vld [vmem:[#allocation1] sm:$0xff]  ;;  %v182_v56 = vadd.f32 %v180_v43, %v148_v42  ;;  %v220_v61 = vsel %vm769_vm5, %v198_v54, 0.0 }
  0xb8   :  { %454 = vrot.lane.b32.xlu0 %v451_v62, %s655_s30  ;;  %452 = vrot.lane.b32.xlu1 %v450_v63, %s655_s30  ;;  %v255_v40 = vpop.permute.xlu2 %254  ;;  %v181_v63 = vadd.f32 %v179_v52, %v147_v51  ;;  %v227_v5 = vmul.f32 %v225_v60, %v220_v61  ;;  %v341_v51 = vstv %s810_s13 }
  0xb9   :  { %v187_v4 = vadd.f32 %v185_v57, %v182_v56  ;;  %v261_v29 = vsel %vm244_vm7, 0.0, %v255_v40  ;;  %v346_v56 = vstv %s812_s14 }
  0xba   :  { %v186_v9 = vadd.f32 %v184_v0, %v181_v63  ;;  %v264_v34 = vsel %vm739_vm2, %v261_v29, 0.0 }
  0xbb   :  { %v229_v15 = vadd.f32 %v227_v5, %v187_v4 }
  0xbc   :  { %v228_v22 = vadd.f32 %v226_v10, %v186_v9  ;;  %v389_v10 = vstv %s822_s16 }
  0xbe   :  { %v208_v13 = vpop.permute.xlu1 %207 }
  0xbf   :  { %v211_v1 = vsel %vm197_vm4, %v208_v13, %v210_v20  ;;  %v214_v6 = vsel %vm197_vm4, 0.0, %v208_v13  ;;  %v268_v13 = vstv %s783_s11 }
  0xc0   :  { %v222_v8 = vsel %vm769_vm5, %v211_v1, 0.0  ;;  %v221_v12 = vsel %vm775_vm6, %v214_v6, 0.0 }
  0xc1   :  { %v232_v17 = vmul.f32 %v230_v7, %v222_v8  ;;  %v231_v23 = vmul.f32 %v230_v7, %v221_v12 }
  0xc3   :  { %v234_v27 = vadd.f32 %v232_v17, %v229_v15  ;;  %v233_v32 = vadd.f32 %v231_v23, %v228_v22 }
  0xc7   :  { %v243_v30 = vpop.permute.xlu1 %242  ;;  %v241_v33 = vpop.permute.xlu0 %240 }
  0xc8   :  { %v245_v11 = vsel %vm244_vm7, %v241_v33, %v243_v30  ;;  %v248_v19 = vsel %vm244_vm7, 0.0, %v241_v33  ;;  %v273_v30 = vstv %s792_s12 }
  0xc9   :  { %v263_v20 = vsel %vm735_vm1, %v245_v11, 0.0  ;;  %v262_v26 = vsel %vm739_vm2, %v248_v19, 0.0  ;;  %v274_v39 = vmul.f32 %v273_v30, %v264_v34  ;;  %v423_v19 = vstv %s831_s17 }
  0xca   :  { %v270_v28 = vmul.f32 %v268_v13, %v263_v20  ;;  %v269_v33 = vmul.f32 %v268_v13, %v262_v26 }
  0xcc   :  { %v272_v36 = vadd.f32 %v270_v28, %v234_v27  ;;  %v271_v38 = vadd.f32 %v269_v33, %v233_v32 }
  0xce   :  { %v276_v48 = vadd.f32 %v274_v39, %v271_v38 }
  0xd0   :  { %v257_v62 = vpop.permute.xlu0 %256  ;;  %v292_v61 = vadd.f32 %v711_v44, %v276_v48 }
  0xd1   :  { %v258_v24 = vsel %vm244_vm7, %v255_v40, %v257_v62 }
  0xd2   :  { %v265_v31 = vsel %vm735_vm1, %v258_v24, 0.0  ;;  %v306_v8 = vadd.f32 %v715_v46, %v292_v61 }
  0xd3   :  { %v314_v2 = vpop.permute.xlu2 %313  ;;  %v275_v37 = vmul.f32 %v273_v30, %v265_v31  ;;  %v428_v31 = vstv %s846_s18 }
  0xd5   :  { %v277_v42 = vadd.f32 %v275_v37, %v272_v36  ;;  %v466_v37 = vstv %s854_s19 }
  0xd7   :  { %v293_v54 = vadd.f32 %v713_v45, %v277_v42 }
  0xd9   :  { %v307_v1 = vadd.f32 %v717_v47, %v293_v54 }
  0xe5   :  { %v359_v25 = vpop.permute.xlu2 %358 }
  0xe6   :  { %v364_v59 = vsel %vm360_vm9, %v359_v25, 0.0 }
  0xe7   :  { %v379_v4 = vsel %vm735_vm1, %v364_v59, 0.0 }
  0xe8   :  { %v386_v47 = vmul.f32 %v384_v3, %v379_v4 }
  0xeb   :  { %v767_v50 = vpop.permute.xlu1 %315 }
  0xec   :  { %v321_v43 = vsel %vm317_vm8, %v767_v50, 0.0  ;;  %v318_v55 = vsel %vm317_vm8, %v314_v2, %v767_v50 }
  0xed   :  { %v336_v52 = vsel %vm769_vm5, %v321_v43, 0.0  ;;  %v335_v45 = vsel %vm775_vm6, %v318_v55, 0.0 }
  0xee   :  { %v371_v40 = vpop.permute.xlu2 %370  ;;  %v343_v62 = vmul.f32 %v341_v51, %v336_v52  ;;  %v342_v9 = vmul.f32 %v341_v51, %v335_v45  ;;  %v471_v52 = vstv %s861_s20 }
  0xf0   :  { %v345_v7 = vadd.f32 %v343_v62, %v307_v1  ;;  %v344_v46 = vadd.f32 %v342_v9, %v306_v8 }
  0xf4   :  { %v328_v14 = vpop.permute.xlu1 %327  ;;  %v330_v21 = vpop.permute.xlu0 %329 }
  0xf5   :  { %v334_v49 = vsel %vm317_vm8, %v330_v21, 0.0  ;;  %v331_v63 = vsel %vm317_vm8, %v328_v14, %v330_v21 }
  0xf6   :  { %v338_v57 = vsel %vm769_vm5, %v334_v49, 0.0  ;;  %v337_v5 = vsel %vm775_vm6, %v331_v63, 0.0 }
  0xf7   :  { %v348_v2 = vmul.f32 %v346_v56, %v338_v57  ;;  %v347_v14 = vmul.f32 %v346_v56, %v337_v5 }
  0xf9   :  { %v350_v12 = vadd.f32 %v348_v2, %v345_v7  ;;  %v349_v26 = vadd.f32 %v347_v14, %v344_v46 }
  0xfb   :  { %v388_v16 = vadd.f32 %v386_v47, %v350_v12 }
  0xfd   :  { %v357_v41 = vpop.permute.xlu0 %356 }
  0xfe   :  { %v361_v44 = vsel %vm360_vm9, %v357_v41, %v359_v25 }
  0xff   :  { %v378_v15 = vsel %vm739_vm2, %v361_v44, 0.0 }
 0x100   :  { %v416_v0 = vpop.permute.xlu2 %415  ;;  %v385_v22 = vmul.f32 %v384_v3, %v378_v15 }
 0x101   :  { %v420_v32 = vsel %vm403_vm10, %v416_v0, 0.0 }
 0x102   :  { %v387_v34 = vadd.f32 %v385_v22, %v349_v26  ;;  %v430_v42 = vmul.f32 %v428_v31, %v420_v32 }
 0x106   :  { %v373_v35 = vpop.permute.xlu1 %372 }
 0x107   :  { %v377_v6 = vsel %vm360_vm9, %v373_v35, 0.0  ;;  %v374_v11 = vsel %vm360_vm9, %v371_v40, %v373_v35 }
 0x108   :  { %v381_v17 = vsel %vm735_vm1, %v377_v6, 0.0  ;;  %v380_v13 = vsel %vm739_vm2, %v374_v11, 0.0 }
 0x109   :  { %v439_v21 = vpop.permute.xlu2 %438  ;;  %v391_v23 = vmul.f32 %v389_v10, %v381_v17  ;;  %v390_v28 = vmul.f32 %v389_v10, %v380_v13 }
 0x10b   :  { %v393_v35 = vadd.f32 %v391_v23, %v388_v16  ;;  %v392_v40 = vadd.f32 %v390_v28, %v387_v34 }
 0x10f   :  { %v400_v60 = vpop.permute.xlu1 %399  ;;  %v402_v50 = vpop.permute.xlu0 %401 }
 0x110   :  { %v407_v20 = vsel %vm403_vm10, %v402_v50, 0.0  ;;  %v404_v27 = vsel %vm403_vm10, %v400_v60, %v402_v50 }
 0x111   :  { %v425_v29 = vmul.f32 %v423_v19, %v407_v20  ;;  %v424_v36 = vmul.f32 %v423_v19, %v404_v27 }
 0x113   :  { %v427_v41 = vadd.f32 %v425_v29, %v393_v35  ;;  %v426_v48 = vadd.f32 %v424_v36, %v392_v40 }
 0x115   :  { %v432_v56 = vadd.f32 %v430_v42, %v427_v41 }
 0x118   :  { %v414_v24 = vpop.permute.xlu1 %413 }
 0x119   :  { %v417_v33 = vsel %vm403_vm10, %v414_v24, %v416_v0 }
 0x11a   :  { %v429_v43 = vmul.f32 %v428_v31, %v417_v33 }
 0x11c   :  { %v431_v57 = vadd.f32 %v429_v43, %v426_v48 }
 0x121   :  { %v441_v25 = vpop.permute.xlu0 %440 }
 0x122   :  { %v446_v18 = vsel %vm442_vm11, %v441_v25, 0.0  ;;  %v443_v30 = vsel %vm442_vm11, %v439_v21, %v441_v25 }
 0x123   :  { %v461_v38 = vsel %vm769_vm5, %v446_v18, 0.0  ;;  %v460_v39 = vsel %vm775_vm6, %v443_v30, 0.0 }
 0x124   :  { %v468_v49 = vmul.f32 %v466_v37, %v461_v38  ;;  %v467_v51 = vmul.f32 %v466_v37, %v460_v39 }
 0x126   :  { %v470_v63 = vadd.f32 %v468_v49, %v432_v56  ;;  %v469_v0 = vadd.f32 %v467_v51, %v431_v57 }
 0x12a   :  { %v455_v54 = vpop.permute.xlu0 %454  ;;  %v453_v55 = vpop.permute.xlu1 %452 }
 0x12b   :  { %v459_v59 = vsel %vm442_vm11, %v455_v54, 0.0  ;;  %v456_v60 = vsel %vm442_vm11, %v453_v55, %v455_v54 }
 0x12c   :  { %v463_v61 = vsel %vm769_vm5, %v459_v59, 0.0  ;;  %v462_v62 = vsel %vm775_vm6, %v456_v60, 0.0 }
 0x12d   :  { %v473_v45 = vmul.f32 %v471_v52, %v463_v61  ;;  %v472_v50 = vmul.f32 %v471_v52, %v462_v62 }
 0x12f   :  { %v475_v1 = vadd.f32 %v473_v45, %v470_v63  ;;  %v474_v2 = vadd.f32 %v472_v50, %v469_v0 }
 0x131   :  { %v556_v3 = vmul.f32 -1.442695, %v475_v1  ;;  %v555_v4 = vmul.f32 -1.442695, %v474_v2 }
 0x133   :  { %570 = vpow2.f32 %v556_v3 }
 0x134   :  { %572 = vpow2.f32 %v555_v4 }
 0x139   :  { %v571_v5 = vpop.eup %570 }
 0x13a   :  { %v573_v44 = vpop.eup %572  ;;  %v483_v6 = vadd.f32 1.0, %v571_v5 }
 0x13b   :  { %v482_v7 = vadd.f32 1.0, %v573_v44 }
 0x13c   :  { %574 = vrcp.f32 %v483_v6  ;;  %v510_v11 = vand.u32 2147483648, %v483_v6  ;;  %v508_v14 = vand.u32 2147483647, %v483_v6  ;;  %vm504_vm14 = vweird.f32 %v483_v6 }
 0x13d   :  { %576 = vrcp.f32 %v482_v7  ;;  %v495_v17 = vand.u32 2147483648, %v482_v7  ;;  %v493_v19 = vand.u32 2147483647, %v482_v7  ;;  %vm489_vm15 = vweird.f32 %v482_v7 }
 0x13e   :  { %v511_v20 = vor.u32 1.1754944e-38, %v510_v11  ;;  %vm509_vm2 = vcmp.eq.f32.partialorder %v508_v14, 8.507059e+37 }
 0x13f   :  { %v496_v23 = vor.u32 1.1754944e-38, %v495_v17  ;;  %vm494_vm4 = vcmp.eq.f32.partialorder %v493_v19, 8.507059e+37 }
 0x142   :  { %v575_v53 = vpop.eup %574 }
 0x143   :  { %v577_v8 = vpop.eup %576  ;;  %v500_v58 = vmul.f32 %v575_v53, %v483_v6  ;;  %vm505_vm12 = vweird.f32 %v575_v53 }
 0x144   :  { %v485_v9 = vmul.f32 %v577_v8, %v482_v7  ;;  %vm490_vm13 = vweird.f32 %v577_v8  ;;  %vm506_vm0 = vmor %vm504_vm14, %vm505_vm12 }
 0x145   :  { %v501_v47 = vsub.f32 1.0, %v500_v58  ;;  %vm491_vm1 = vmor %vm489_vm15, %vm490_vm13 }
 0x146   :  { %v486_v10 = vsub.f32 1.0, %v485_v9 }
 0x147   :  { %v502_v12 = vmul.f32 %v575_v53, %v501_v47 }
 0x148   :  { %v487_v15 = vmul.f32 %v577_v8, %v486_v10 }
 0x149   :  { %v503_v46 = vadd.f32 %v575_v53, %v502_v12 }
 0x14a   :  { %v488_v13 = vadd.f32 %v577_v8, %v487_v15 }
 0x14b   :  { %v507_v21 = vsel %vm506_vm0, %v575_v53, %v503_v46 }
 0x14c   :  { %v492_v22 = vsel %vm491_vm1, %v577_v8, %v488_v13  ;;  %v512_v24 = vsel %vm509_vm2, %v511_v20, %v507_v21 }
 0x14d   :  { %v516_v25 = vrot.slane %v512_v24, 6  ;;  %v497_v26 = vsel %vm494_vm4, %v496_v23, %v492_v22 }
 0x14f   :  { %v518_v16 = vsel %vm517_vm3, %v497_v26, %v516_v25 }
 0x150   :  { %520 = vst [vmem:[#allocation8] sm:$0xf] %v518_v16 }
 0x151   :  { %531 = dma.vmem_to_hbm [thread:$0]  %s527_s22, 64, %s529_s23, [#allocation7]  }
 0x152   :  { %642 = dma.done.wait [#allocation7], 64  }
 0x153   :  { %643 = vsyncadd [#allocation7], 4294967232 }
 0x154   :  { %536 = vsyncpa [#allocation6], 1 }
 0x155   :  { %537 = vsyncpa [#allocation7], 1 }

</bundles_post_ra>
